<compile_context>
chip_gen: v7x
topology: tpu7x:2x2x1
jax: 0.10.0
libtpu: 0.0.40
codegen_flags: <defaults>
</compile_context>

<pallas_src>
import functools

import jax
import jax.numpy as jnp
from jax import lax
from jax.experimental import pallas as pl
from jax.experimental.pallas import tpu as pltpu

INPUT_DIM = 64
HIDDEN_DIM = 64
OUTPUT_DIM = 14


def _gelu(x, approximate):
    if approximate:
        # tanh formulation -> EUP slot (frees the VALU slot on v6e/v7x).
        c = jnp.sqrt(2.0 / jnp.pi).astype(x.dtype)
        return 0.5 * x * (1.0 + jnp.tanh(c * (x + 0.044715 * x * x * x)))
    # PyTorch nn.GELU() default = exact erf formulation.
    return 0.5 * x * (1.0 + lax.erf(x * (1.0 / jnp.sqrt(2.0).astype(x.dtype))))


def domain_classifier_kernel(x_ref, w1_ref, b1_ref, w2_ref, b2_ref, o_ref, *,
                             approximate_gelu):
    x = x_ref[...]                                                     # (bm, 64)
    h = jnp.dot(x, w1_ref[...], preferred_element_type=jnp.float32)   # MXU
    h = h + b1_ref[...]                                                # broadcast (1, 64)
    h = _gelu(h, approximate_gelu)                                     # VPU/EUP
    # Dropout(p=0.3): identity in eval/inference mode.
    # TODO(synk): training-mode dropout (stochastic mask via pltpu.prng_random_bits) not emitted.
    y = jnp.dot(h, w2_ref[...], preferred_element_type=jnp.float32)   # (bm, 14)
    o_ref[...] = (y + b2_ref[...]).astype(o_ref.dtype)


def domain_classifier(x, w1, b1, w2, b2, *, bm_max=8192, approximate_gelu=False,
                      training=False):
    """x: (B, 64) f32; w1: (64, 64); b1: (1, 64); w2: (64, 14); b2: (1, 14)."""
    if training:
        raise NotImplementedError(
            "DomainClassifier Pallas kernel implements eval mode only "
            "(Dropout(p=0.3) is identity)."
        )
    assert bm_max % 8 == 0, "bm_max must be a multiple of 8 (f32 sublane tiling)"
    B, D = x.shape
    assert D == INPUT_DIM, f"expected last dim {INPUT_DIM}, got {D}"

    # Batch tile: if the whole batch fits in one tile, use the exact batch size
    # (block dim == full array dim, so no alignment constraint and no padding).
    # Otherwise use the large aligned tile and let Pallas clip the partial last
    # block — rows are independent, OOB output rows are discarded.
    bm = B if B <= bm_max else bm_max
    grid = (pl.cdiv(B, bm),)

    param_bytes = 4 * (INPUT_DIM * HIDDEN_DIM + HIDDEN_DIM
                       + HIDDEN_DIM * OUTPUT_DIM + OUTPUT_DIM)
    cost = pl.CostEstimate(
        flops=2 * B * HIDDEN_DIM * (INPUT_DIM + OUTPUT_DIM),
        transcendentals=B * HIDDEN_DIM,
        bytes_accessed=B * 4 * (INPUT_DIM + OUTPUT_DIM) + param_bytes,
    )

    kernel = functools.partial(domain_classifier_kernel,
                               approximate_gelu=approximate_gelu)

    return pl.pallas_call(
        kernel,
        out_shape=jax.ShapeDtypeStruct((B, OUTPUT_DIM), x.dtype),
        grid_spec=pl.GridSpec(
            grid=grid,
            in_specs=[
                pl.BlockSpec((bm, INPUT_DIM), lambda i: (i, 0)),
                pl.BlockSpec((INPUT_DIM, HIDDEN_DIM), lambda i: (0, 0)),
                pl.BlockSpec((1, HIDDEN_DIM), lambda i: (0, 0)),
                pl.BlockSpec((HIDDEN_DIM, OUTPUT_DIM), lambda i: (0, 0)),
                pl.BlockSpec((1, OUTPUT_DIM), lambda i: (0, 0)),
            ],
            out_specs=pl.BlockSpec((bm, OUTPUT_DIM), lambda i: (i, 0)),
        ),
        compiler_params=pltpu.CompilerParams(
            dimension_semantics=("parallel",),
            vmem_limit_bytes=48 * 1024 * 1024,
        ),
        cost_estimate=cost,
    )(x, w1, b1, w2, b2)


def reference(x, w1, b1, w2, b2):
    h = x @ w1 + b1
    h = _gelu(h, approximate=False)
    return h @ w2 + b2


if __name__ == "__main__":
    key = jax.random.PRNGKey(0)
    kx, k1, k2, k3, k4 = jax.random.split(key, 5)

    B = 8  # small batch, single full-batch tile
    x = jax.random.normal(kx, (B, INPUT_DIM), dtype=jnp.float32)

    # Deterministic nn.Linear-like init; weights built as [in, out] for x @ W.
    bound1 = 1.0 / jnp.sqrt(INPUT_DIM)
    w1 = jax.random.uniform(k1, (INPUT_DIM, HIDDEN_DIM), jnp.float32, -bound1, bound1)
    b1 = jax.random.uniform(k2, (1, HIDDEN_DIM), jnp.float32, -bound1, bound1)
    bound2 = 1.0 / jnp.sqrt(HIDDEN_DIM)
    w2 = jax.random.uniform(k3, (HIDDEN_DIM, OUTPUT_DIM), jnp.float32, -bound2, bound2)
    b2 = jax.random.uniform(k4, (1, OUTPUT_DIM), jnp.float32, -bound2, bound2)

    out = domain_classifier(x, w1, b1, w2, b2)
    out = jax.block_until_ready(out)
    ref = reference(x, w1, b1, w2, b2)
    assert out.shape == (B, OUTPUT_DIM)
    assert jnp.allclose(out, ref, atol=1e-5, rtol=1e-5), "mismatch vs reference (B=8)"

    # Exercise the multi-step grid with a clipped partial last block (no padding path).
    B2 = 300
    x2 = jax.random.normal(kx, (B2, INPUT_DIM), dtype=jnp.float32)
    out2 = domain_classifier(x2, w1, b1, w2, b2, bm_max=256)
    out2 = jax.block_until_ready(out2)
    ref2 = reference(x2, w1, b1, w2, b2)
    assert out2.shape == (B2, OUTPUT_DIM)
    assert jnp.allclose(out2, ref2, atol=1e-5, rtol=1e-5), "mismatch vs reference (B=300)"

    print("KERNEL_OK")
</pallas_src>

<mosaic_0001>
module attributes {stable_mosaic.version = 11 : i64} {
  func.func @domain_classifier_kernel(%arg0: i32, %arg1: memref<8x64xf32, #tpu.memory_space<vmem>>, %arg2: memref<64x64xf32, #tpu.memory_space<vmem>>, %arg3: memref<1x64xf32, #tpu.memory_space<vmem>>, %arg4: memref<64x14xf32, #tpu.memory_space<vmem>>, %arg5: memref<1x14xf32, #tpu.memory_space<vmem>>, %arg6: memref<8x14xf32, #tpu.memory_space<vmem>>) attributes {dimension_semantics = [#tpu.dimension_semantics<parallel>], iteration_bounds = array<i64: 1>, scalar_prefetch = 0 : i64, scratch_operands = 0 : i64, tpu.core_type = #tpu.core_type<tc>, window_params = [{transform_indices = @transform_0, window_bounds = array<i64: 8, 64>}, {pipeline_mode = #tpu.pipeline_mode<synchronous>, transform_indices = @transform_1, window_bounds = array<i64: 64, 64>}, {pipeline_mode = #tpu.pipeline_mode<synchronous>, transform_indices = @transform_2, window_bounds = array<i64: 1, 64>}, {pipeline_mode = #tpu.pipeline_mode<synchronous>, transform_indices = @transform_3, window_bounds = array<i64: 64, 14>}, {pipeline_mode = #tpu.pipeline_mode<synchronous>, transform_indices = @transform_4, window_bounds = array<i64: 1, 14>}, {transform_indices = @transform_5, window_bounds = array<i64: 8, 14>}]} {
    %c0 = arith.constant 0 : index
    %c0_0 = arith.constant 0 : index
    %0 = vector.load %arg1[%c0, %c0_0] : memref<8x64xf32, #tpu.memory_space<vmem>>, vector<8x64xf32>
    %c0_1 = arith.constant 0 : index
    %c0_2 = arith.constant 0 : index
    %1 = vector.load %arg2[%c0_1, %c0_2] : memref<64x64xf32, #tpu.memory_space<vmem>>, vector<64x64xf32>
    %cst = arith.constant dense<0.000000e+00> : vector<8x64xf32>
    %2 = tpu.matmul %0, %1, %cst {dimension_numbers = #tpu.dot_dimension_numbers<[1], [0], [0], [1], [0, 0, 1, 1], [], []>} : vector<8x64xf32>, vector<64x64xf32>, vector<8x64xf32> -> vector<8x64xf32>
    %c0_3 = arith.constant 0 : index
    %c0_4 = arith.constant 0 : index
    %3 = vector.load %arg3[%c0_3, %c0_4] : memref<1x64xf32, #tpu.memory_space<vmem>>, vector<1x64xf32>
    %4 = vector.broadcast %3 : vector<1x64xf32> to vector<8x64xf32>
    %5 = arith.addf %2, %4 : vector<8x64xf32>
    %cst_5 = arith.constant 5.000000e-01 : f32
    %6 = vector.broadcast %cst_5 : f32 to vector<8x64xf32>
    %7 = arith.mulf %6, %5 : vector<8x64xf32>
    %cst_6 = arith.constant 2.000000e+00 : f32
    %8 = math.sqrt %cst_6 : f32
    %cst_7 = arith.constant 1.000000e+00 : f32
    %9 = arith.divf %cst_7, %8 : f32
    %10 = vector.broadcast %9 : f32 to vector<8x64xf32>
    %11 = arith.mulf %5, %10 : vector<8x64xf32>
    %12 = math.erf %11 : vector<8x64xf32>
    %cst_8 = arith.constant 1.000000e+00 : f32
    %13 = vector.broadcast %cst_8 : f32 to vector<8x64xf32>
    %14 = arith.addf %13, %12 : vector<8x64xf32>
    %15 = arith.mulf %7, %14 : vector<8x64xf32>
    %c0_9 = arith.constant 0 : index
    %c0_10 = arith.constant 0 : index
    %16 = vector.load %arg4[%c0_9, %c0_10] : memref<64x14xf32, #tpu.memory_space<vmem>>, vector<64x14xf32>
    %cst_11 = arith.constant dense<0.000000e+00> : vector<8x14xf32>
    %17 = tpu.matmul %15, %16, %cst_11 {dimension_numbers = #tpu.dot_dimension_numbers<[1], [0], [0], [1], [0, 0, 1, 1], [], []>} : vector<8x64xf32>, vector<64x14xf32>, vector<8x14xf32> -> vector<8x14xf32>
    %c0_12 = arith.constant 0 : index
    %c0_13 = arith.constant 0 : index
    %18 = vector.load %arg5[%c0_12, %c0_13] : memref<1x14xf32, #tpu.memory_space<vmem>>, vector<1x14xf32>
    %19 = vector.broadcast %18 : vector<1x14xf32> to vector<8x14xf32>
    %20 = arith.addf %17, %19 : vector<8x14xf32>
    %c0_14 = arith.constant 0 : index
    %c0_15 = arith.constant 0 : index
    %21 = vector.load %arg6[%c0_14, %c0_15] : memref<8x14xf32, #tpu.memory_space<vmem>>, vector<8x14xf32>
    tpu.vector_store %arg6[%c0_14, %c0_15], %20 {strides = array<i32>} : memref<8x14xf32, #tpu.memory_space<vmem>>, vector<8x14xf32>,
    return
  }
  func.func @transform_0(%arg0: i32) -> (i32, i32) {
    %c0_i32 = arith.constant 0 : i32
    %c0_i32_0 = arith.constant 0 : i32
    return %arg0, %c0_i32 : i32, i32
  }
  func.func @transform_1(%arg0: i32) -> (i32, i32) {
    %c0_i32 = arith.constant 0 : i32
    %c0_i32_0 = arith.constant 0 : i32
    %c0_i32_1 = arith.constant 0 : i32
    return %c0_i32, %c0_i32_0 : i32, i32
  }
  func.func @transform_2(%arg0: i32) -> (i32, i32) {
    %c0_i32 = arith.constant 0 : i32
    %c0_i32_0 = arith.constant 0 : i32
    %c0_i32_1 = arith.constant 0 : i32
    return %c0_i32, %c0_i32_0 : i32, i32
  }
  func.func @transform_3(%arg0: i32) -> (i32, i32) {
    %c0_i32 = arith.constant 0 : i32
    %c0_i32_0 = arith.constant 0 : i32
    %c0_i32_1 = arith.constant 0 : i32
    return %c0_i32, %c0_i32_0 : i32, i32
  }
  func.func @transform_4(%arg0: i32) -> (i32, i32) {
    %c0_i32 = arith.constant 0 : i32
    %c0_i32_0 = arith.constant 0 : i32
    %c0_i32_1 = arith.constant 0 : i32
    return %c0_i32, %c0_i32_0 : i32, i32
  }
  func.func @transform_5(%arg0: i32) -> (i32, i32) {
    %c0_i32 = arith.constant 0 : i32
    %c0_i32_0 = arith.constant 0 : i32
    return %arg0, %c0_i32 : i32, i32
  }
}

</mosaic_0001>

<bundles_post_ra>
// kernel: tpu_custom_call.1
= control target key start
LH: loop header
LB: loop body
LE: loop exit
PB: predicated region body
PF: predicated region fallthrough
CT: control target
= control target key end

     0   :  { %v334_v3 = vmov 0.0|0.0   ;;  %vm335_vm0 = vmmov 0   ;;  %v336_v6 = vmov 0.0   ;;  %s439_s0 = inlined_call_operand.vmem [shape: f32[8,64], index: 0, kind: input, shape index: {}]   ;;  %s440_s1 = inlined_call_operand.vmem [shape: f32[64,64], index: 1, kind: input, shape index: {}]   ;;  %s441_s2 = inlined_call_operand.vmem [shape: f32[1,64], index: 2, kind: input, shape index: {}]   ;;  %s442_s3 = inlined_call_operand.vmem [shape: f32[64,14], index: 3, kind: input, shape index: {}]   ;;  %s443_s4 = inlined_call_operand.vmem [shape: f32[1,14], index: 4, kind: input, shape index: {}]   ;;  %s444_s5 = inlined_call_operand.hbm [shape: f32[8,14], index: 5, kind: output, shape index: {}]  }
   0x1   :  { %v22_v0 = vld [vmem:[%s440_s1] sm:$0xff]  ;;  %v23_v1 = vld [vmem:[%s440_s1 + $0x8] sm:$0xff]  ;;  %v24_v2 = vld [vmem:[%s440_s1 + $0x10] sm:$0xff]  ;;  %280 = vmatprep.subr.bf16.mxu0 %v334_v3  ;;  %258 = vmatprep.mubr.msk.f32.mxu0 %vm335_vm0, %v336_v6 }
   0x2   :  { %v281_v4 = vpack.c.bf16 %v23_v1, %v22_v0  ;;  %v25_v5 = vld [vmem:[%s440_s1 + $0x18] sm:$0xff]  ;;  %292 = vmatprep.subr.bf16.mxu1 %v334_v3  ;;  %277 = vmatprep.mubr.msk.f32.mxu1 %vm335_vm0, %v336_v6 }
   0x3   :  { %v284_v7 = vpack.c.bf16 %v25_v5, %v24_v2 }
   0x4   :  { %282 = vmatpush3.bf16.msra.mxu0 %v281_v4 }
   0x5   :  { %10 = vsyncpa [#allocation3], 0  ;;  %283 = vmatprep.subr.bf16.mxu0 %v334_v3  ;;  %v26_v8 = vld [vmem:[%s440_s1 + $0x20] sm:$0xff]  ;;  %v27_v9 = vld [vmem:[%s440_s1 + $0x28] sm:$0xff]  ;;  %vm37_vm1 = vcmask 523264   ;;  %vm204_vm2 = vcmask 113664  }
   0x6   :  { %v287_v10 = vpack.c.bf16 %v27_v9, %v26_v8  ;;  %v28_v11 = vld [vmem:[%s440_s1 + $0x30] sm:$0xff]  ;;  %v29_v12 = vld [vmem:[%s440_s1 + $0x38] sm:$0xff]  ;;  %v21_v14 = vld [vmem:[%s439_s0] sm:$0xff] }
   0x7   :  { %v290_v13 = vpack.c.bf16 %v29_v12, %v28_v11  ;;  %v116_v15 = vld [vmem:[%s442_s3] sm:$0xff]  ;;  %v117_v16 = vld [vmem:[%s442_s3 + $0x8] sm:$0xff]  ;;  %v118_v18 = vld [vmem:[%s442_s3 + $0x10] sm:$0xff] }
   0x8   :  { %285 = vmatpush3.bf16.msra.mxu0 %v284_v7  ;;  %v293_v17 = vpack.c.bf16 %v117_v16, %v116_v15  ;;  %v119_v19 = vld [vmem:[%s442_s3 + $0x18] sm:$0xff]  ;;  %v120_v21 = vld [vmem:[%s442_s3 + $0x20] sm:$0xff]  ;;  %v121_v22 = vld [vmem:[%s442_s3 + $0x28] sm:$0xff] }
   0x9   :  { %286 = vmatprep.subr.bf16.mxu0 %v334_v3  ;;  %v296_v20 = vpack.c.bf16 %v119_v19, %v118_v18  ;;  %v299_v23 = vpack.c.bf16 %v121_v22, %v120_v21  ;;  %v122_v24 = vld [vmem:[%s442_s3 + $0x30] sm:$0xff]  ;;  %v123_v25 = vld [vmem:[%s442_s3 + $0x38] sm:$0xff]  ;;  %v220_v27 = vld [vmem:[%s441_s2] ss:$0 sm:$0xff]  ;;  %s337_s3 = smov [#allocation2]  }
   0xa   :  { %294 = vmatpush3.bf16.msra.mxu1 %v293_v17  ;;  %v302_v26 = vpack.c.bf16 %v123_v25, %v122_v24  ;;  %v222_v36 = vld [vmem:[%s443_s4] ss:$0 sm:$0xff]  ;;  %s212_s29 = sshll.u32 %s337_s3, 4  ;;  %s213_s29 = int_to_ptr.vmem [resolvable:$true] %s212_s29 }
   0xb   :  { %295 = vmatprep.subr.bf16.mxu1 %v334_v3  ;;  %s310_s2 = scalar_lea.vmem %s213_s29, 128  ;;  %p315_p1 = scmp.lt.s32.totalorder %s213_s29, %s213_s29 }
   0xc   :  { %288 = vmatpush3.bf16.msra.mxu0 %v287_v10  ;;  %p311_p0 = scmp.ne.s32.totalorder %s213_s29, %s310_s2  ;;  %p316_p2 = scmp.lt.s32.totalorder %s310_s2, %s310_s2 }
   0xd   :  { %289 = vmatprep.subr.bf16.mxu0 %v334_v3 }
   0xe   :  { %297 = vmatpush3.bf16.msra.mxu1 %v296_v20  ;;  %p317_p3 = por %p316_p2, %p315_p1 }
   0xf   :  { %298 = vmatprep.subr.bf16.mxu1 %v334_v3 }
  0x10   :  { %291 = vmatpush3.bf16.msra.mxu0 %v290_v13  ;;  %p318_p4 = pnand %p317_p3, %p311_p0 }
  0x12   :  { %300 = vmatpush3.bf16.msra.mxu1 %v299_v23 }
  0x13   :  { %259 = vmatmul.mubr.msk.f32.vlgmr.msra.gmra.mrb[0].mxu0 %vm37_vm1, %v21_v14  ;;  %301 = vmatprep.subr.bf16.mxu1 %v334_v3 }
  0x16   :  { %303 = vmatpush3.bf16.msra.mxu1 %v302_v26 }
  0xe6   :  { %v107_v28 = vpop.f32.mrb[0].mxu0 }
  0xe7   :  { %v108_v29 = vadd.f32 %v220_v27, %v107_v28  ;;  %v260_v30 = vpop.f32.mrb[1].mxu0 }
  0xe9   :  { %v112_v31 = vmul.f32 0.70710677, %v108_v29  ;;  %v111_v33 = vmul.f32 0.5, %v108_v29 }
  0xeb   :  { %308 = verf.f32 %v112_v31 }
  0xf5   :  { %v309_v32 = vpop.eup %308 }
  0xf6   :  { %v114_v34 = vadd.f32 1.0, %v309_v32 }
  0xf8   :  { %v115_v35 = vmul.f32 %v114_v34, %v111_v33 }
  0xfa   :  { %278 = vmatmul.mubr.msk.f32.vlgmr.msra.gmra.mrb[0].mxu1 %vm37_vm1, %v115_v35 }
 0x1cd   :  { %v200_v37 = vpop.f32.mrb[0].mxu1 }
 0x1ce   :  { %v201_v38 = vadd.f32 %v222_v36, %v200_v37  ;;  %v279_v39 = vpop.f32.mrb[1].mxu1 }
 0x1d0   :  { %205 = vst.msk [vmem:[#allocation2] sm:$0xff] %vm204_vm2, %v201_v38 }
 0x1d1   :  { %321 = shalt.err (!%p318_p4)
}
 0x1d2   :  { %s322_s7 = scalar_lea.hbm %s444_s5, 128 }
 0x1d3   :  { %p323_p5 = scmp.ne.s32.totalorder %s444_s5, %s322_s7  ;;  %p326_p6 = scmp.lt.u32.totalorder %s322_s7, %s444_s5 }
 0x1d5   :  { %p328_p7 = pnand %p326_p6, %p323_p5 }
 0x1d7   :  { %331 = shalt.err (!%p328_p7)
}
 0x1d8   :  { %215 = dma.vmem_to_hbm [thread:$0]  %s213_s29, 128, %s444_s5, [#allocation3]  }
 0x1d9   :  { %332 = dma.done.wait [#allocation3], 128  }
 0x1da   :  { %333 = vsyncadd [#allocation3], 4294967168 }
 0x1db   :  { %219 = vsyncpa [#allocation3], 1 }

</bundles_post_ra>
